<compile_context>
chip_gen: v5e
topology: v5e:2x2
jax: 0.10.0
libtpu: 0.0.40
codegen_flags: <defaults>
</compile_context>

<pallas_src>
import functools

import numpy as np
import jax
import jax.numpy as jnp
from jax import lax
from jax.experimental import pallas as pl
from jax.experimental.pallas import tpu as pltpu


MATMUL_DTYPE = jnp.bfloat16   # MXU operand dtype; accumulation is always f32.


# ----------------------------- kernel ------------------------------------- #

def _conv3x3_rowpair(a_f32, t_ref):
    """3x3 'SAME' conv on a row-pair-packed activation.

    a_f32 : (M, L) f32 value; super-row r holds image rows (2r, 2r+1), with
            zero separator / pad rows between stacked images.
    t_ref : (3, L, L) bf16 ref; tap 0/1/2 multiply the (r-1, r, r+1) super-rows
            (dx taps, left/right padding and the row-pair structure folded in,
            plus the BN scale).
    returns (M, L) f32.
    """
    M = a_f32.shape[0]
    dt = t_ref.dtype
    # +/-1 super-row shifts via XLU roll (no concat, no misaligned slices).
    # Wrapped rows are zero by construction (separator / trailing pad rows).
    # Rolls are done in f32 (always-supported sublane rotate); the bf16 casts
    # below are single-vreg VPU ops.
    a_prev = pltpu.roll(a_f32, shift=1, axis=0)       # a_prev[r] = a[r-1]
    a_next = pltpu.roll(a_f32, shift=M - 1, axis=0)   # a_next[r] = a[r+1]
    acc = jnp.dot(a_prev.astype(dt), t_ref[0], preferred_element_type=jnp.float32)
    acc = acc + jnp.dot(a_f32.astype(dt), t_ref[1], preferred_element_type=jnp.float32)
    acc = acc + jnp.dot(a_next.astype(dt), t_ref[2], preferred_element_type=jnp.float32)
    return acc


def basic_block_kernel(x_ref, t1_ref, b1_ref, t2_ref, b2_ref, o_ref, *,
                       rows_per_img, n_valid):
    """One block of stacked images per grid step.

    x_ref  : (1, M, L) f32   row-pair-packed input (zero separators / pads)
    t1_ref : (3, L, L) bf16  conv1 Toeplitz weights with BN1 scale folded in
    b1_ref : (1, L)    f32   BN1 bias (per-lane)
    t2_ref : (3, L, L) bf16  conv2 Toeplitz weights with BN2 scale folded in
    b2_ref : (1, L)    f32   BN2 bias (per-lane)
    o_ref  : (1, M, L) f32   output (separator / pad rows are garbage, dropped
                             by the wrapper)
    """
    x = x_ref[0]                                           # (M, L) f32
    M = x.shape[0]

    h = _conv3x3_rowpair(x, t1_ref)                        # conv1 * bn1.scale
    h = jnp.maximum(h + b1_ref[...], 0.0)                  # bn1 bias + relu

    # Zero the separator / trailing-pad rows so conv2's implicit top/bottom
    # zero padding stays correct for every image in the stack.
    rows = lax.broadcasted_iota(jnp.int32, (M, 1), 0)
    real = jnp.logical_and(rows % rows_per_img < rows_per_img - 1,
                           rows < n_valid)
    h = jnp.where(real, h, 0.0)

    out = _conv3x3_rowpair(h, t2_ref)                      # conv2 * bn2.scale
    out = out + b2_ref[...]                                # bn2 bias

    # Residual: Cin == Cout so the packed layouts coincide; x separator rows
    # are zero, garbage output rows are discarded by the wrapper.
    o_ref[0] = jnp.maximum(out + x, 0.0)


# ----------------------------- wrapper ------------------------------------- #

def _fold_bn(gamma, beta, mean, var, eps=1e-5):
    scale = gamma / jnp.sqrt(var + eps)
    bias = beta - mean * scale
    return scale, bias


def _toeplitz_rowpair_weights(w_hwio, W, scale):
    """(3,3,Cin,Cout) HWIO weights -> (3, 2*W*Cin, 2*W*Cout) per-tap matrices.

    Tap 0/1/2 multiply super-rows (r-1, r, r+1).  Lane layout within a super
    row is sub*(W*C) + x*C + c with sub in {0,1} selecting the image row.
    The BN scale (per output channel) is folded in, in f32.
    """
    Cin, Cout = int(w_hwio.shape[2]), int(w_hwio.shape[3])
    w = w_hwio * scale[None, None, None, :]                 # fold BN scale (f32)

    # x-axis block-Toeplitz per row tap ky: T_x[ky][xin*Cin+ci, xo*Cout+co]
    #   = w[ky, kx=xin-xo+1, ci, co]  (zero outside |xin-xo|<=1 -> padding=1)
    place = np.zeros((3, W, W), np.float32)                 # (kx, xin, xout)
    for kx in range(3):
        for xo in range(W):
            xin = xo + kx - 1
            if 0 <= xin < W:
                place[kx, xin, xo] = 1.0
    tx = jnp.einsum('kpx,ykio->ypixo', jnp.asarray(place), w)
    tx = tx.reshape(3, W * Cin, W * Cout)                   # (ky, W*Cin, W*Cout)

    z = jnp.zeros_like(tx[0])
    # Row-pair structure: out super-row r holds image rows (2r, 2r+1).
    t_prev = jnp.block([[z,     z    ],
                        [tx[0], z    ]])    # row 2r-1 -> out 2r (ky=0)
    t_cur  = jnp.block([[tx[1], tx[0]],     # row 2r   -> out 2r (ky=1), 2r+1 (ky=0)
                        [tx[2], tx[1]]])    # row 2r+1 -> out 2r (ky=2), 2r+1 (ky=1)
    t_next = jnp.block([[z,     tx[2]],     # row 2r+2 -> out 2r+1 (ky=2)
                        [z,     z    ]])
    return jnp.stack([t_prev, t_cur, t_next], axis=0)       # (3, 2*W*Cin, 2*W*Cout)


def basic_block_pallas(x_nchw, w1, bn1, w2, bn2, *, images_per_step=None):
    """x_nchw: (B, Cin, H, W); conv weights in PyTorch layout (Cout, Cin, 3, 3)."""
    B, Cin, H, W = x_nchw.shape
    Cout = w1.shape[0]
    assert Cin == Cout, "BasicBlock with downsample=None needs inplanes == planes"
    assert H % 2 == 0, "row-pair packing needs even H"
    H2 = H // 2
    L = 2 * W * Cin                          # lane width (128 for W=16, C=4)

    # Grid / stacking layout: Bblk images per grid step, each followed by one
    # zero separator super-row; total rows padded to a multiple of 8 sublanes.
    if images_per_step is None:
        images_per_step = B // 2 if (B % 2 == 0 and B >= 2) else B
    assert B % images_per_step == 0
    Bblk = images_per_step
    num_blocks = B // Bblk
    rows_per_img = H2 + 1                    # H2 real super-rows + 1 separator
    n_valid = Bblk * rows_per_img
    Mstk = ((n_valid + 7) // 8) * 8

    # NCHW -> NHWC -> row-pair packed (free reshapes); insert zero separators.
    x_rows = jnp.transpose(x_nchw, (0, 2, 3, 1)).astype(jnp.float32)
    x_rows = x_rows.reshape(B, H2, L)
    x_rows = jnp.pad(x_rows, ((0, 0), (0, 1), (0, 0)))       # (B, H2+1, L)
    x_stk = x_rows.reshape(num_blocks, n_valid, L)
    x_stk = jnp.pad(x_stk, ((0, 0), (0, Mstk - n_valid), (0, 0)))

    # BN folding: scale goes into the bf16 Toeplitz weights (multiplied in
    # f32 first), bias stays as a per-lane f32 vector.
    s1, b1 = _fold_bn(*bn1)
    s2, b2 = _fold_bn(*bn2)
    w1_hwio = jnp.transpose(w1, (2, 3, 1, 0)).astype(jnp.float32)
    w2_hwio = jnp.transpose(w2, (2, 3, 1, 0)).astype(jnp.float32)
    t1 = _toeplitz_rowpair_weights(w1_hwio, W, s1).astype(MATMUL_DTYPE)
    t2 = _toeplitz_rowpair_weights(w2_hwio, W, s2).astype(MATMUL_DTYPE)
    b1v = jnp.tile(b1.astype(jnp.float32), 2 * W).reshape(1, L)
    b2v = jnp.tile(b2.astype(jnp.float32), 2 * W).reshape(1, L)

    kernel = functools.partial(basic_block_kernel,
                               rows_per_img=rows_per_img, n_valid=n_valid)
    inv3 = lambda b: (0, 0, 0)     # grid-invariant weight blocks
    inv2 = lambda b: (0, 0)        # grid-invariant bias blocks

    out_stk = pl.pallas_call(
        kernel,
        out_shape=jax.ShapeDtypeStruct((num_blocks, Mstk, L), jnp.float32),
        grid=(num_blocks,),
        in_specs=[
            pl.BlockSpec((1, Mstk, L), lambda b: (b, 0, 0)),   # x (pipelined)
            pl.BlockSpec((3, L, L), inv3),                     # conv1 weights
            pl.BlockSpec((1, L), inv2),                        # bn1 bias
            pl.BlockSpec((3, L, L), inv3),                     # conv2 weights
            pl.BlockSpec((1, L), inv2),                        # bn2 bias
        ],
        out_specs=pl.BlockSpec((1, Mstk, L), lambda b: (b, 0, 0)),
        compiler_params=pltpu.CompilerParams(
            dimension_semantics=("parallel",)),   # shard blocks across TCs
    )(x_stk, t1, b1v, t2, b2v)

    # Drop trailing pad rows and separator rows, unpack the row pairs.
    out = out_stk[:, :n_valid].reshape(num_blocks, Bblk, rows_per_img, L)
    out = out[:, :, :H2].reshape(B, H2, 2, W, Cout).reshape(B, H, W, Cout)
    return jnp.transpose(out, (0, 3, 1, 2))                   # back to NCHW


# ----------------------------- reference ----------------------------------- #

def basic_block_reference(x_nchw, w1, bn1, w2, bn2):
    """Pure-JAX reference with the same mixed-precision / BN-fold policy
    (BN scale folded into bf16 conv weights, f32 accumulation / bias / ReLU /
    residual) so only accumulation-order differences remain."""
    x = jnp.transpose(x_nchw, (0, 2, 3, 1)).astype(jnp.float32)
    s1, b1 = _fold_bn(*bn1)
    s2, b2 = _fold_bn(*bn2)
    w1_hwio = jnp.transpose(w1, (2, 3, 1, 0)).astype(jnp.float32) * s1
    w2_hwio = jnp.transpose(w2, (2, 3, 1, 0)).astype(jnp.float32) * s2
    dn = ('NHWC', 'HWIO', 'NHWC')

    def conv(a, w):
        return lax.conv_general_dilated(
            a.astype(MATMUL_DTYPE), w.astype(MATMUL_DTYPE), (1, 1), 'SAME',
            dimension_numbers=dn, preferred_element_type=jnp.float32)

    h = jnp.maximum(conv(x, w1_hwio) + b1, 0.0)
    out = conv(h, w2_hwio) + b2
    out = jnp.maximum(out + x, 0.0)
    return jnp.transpose(out, (0, 3, 1, 2))


# ------------------------------ test --------------------------------------- #

if __name__ == "__main__":
    key = jax.random.PRNGKey(0)
    B, C, H, W = 2, 4, 16, 16   # inplanes = planes = 4, stride = 1, no downsample

    ks = jax.random.split(key, 11)
    x = jax.random.normal(ks[0], (B, C, H, W), jnp.float32)
    w1 = jax.random.normal(ks[1], (C, C, 3, 3), jnp.float32) * 0.1
    w2 = jax.random.normal(ks[2], (C, C, 3, 3), jnp.float32) * 0.1
    bn1 = (
        1.0 + 0.1 * jax.random.normal(ks[3], (C,), jnp.float32),   # gamma
        0.1 * jax.random.normal(ks[4], (C,), jnp.float32),         # beta
        0.1 * jax.random.normal(ks[5], (C,), jnp.float32),         # running_mean
        0.5 + jax.random.uniform(ks[6], (C,), jnp.float32),        # running_var
    )
    bn2 = (
        1.0 + 0.1 * jax.random.normal(ks[7], (C,), jnp.float32),
        0.1 * jax.random.normal(ks[8], (C,), jnp.float32),
        0.1 * jax.random.normal(ks[9], (C,), jnp.float32),
        0.5 + jax.random.uniform(ks[10], (C,), jnp.float32),
    )

    out = jax.block_until_ready(basic_block_pallas(x, w1, bn1, w2, bn2))
    ref = jax.block_until_ready(basic_block_reference(x, w1, bn1, w2, bn2))

    assert out.shape == (B, C, H, W)
    # Both sides use bf16 matmul operands (with BN scale folded in f32 before
    # the bf16 cast) and f32 accumulation; tolerance covers summation-order
    # and bf16 re-rounding differences only.
    assert jnp.allclose(out, ref, atol=1e-2, rtol=1e-2), "mismatch vs reference"

    print("KERNEL_OK")
</pallas_src>

<mosaic_0001>
module attributes {stable_mosaic.version = 11 : i64} {
  func.func @basic_block_kernel(%arg0: i32, %arg1: memref<1x16x128xf32, #tpu.memory_space<vmem>>, %arg2: memref<3x128x128xbf16, #tpu.memory_space<vmem>>, %arg3: memref<1x128xf32, #tpu.memory_space<vmem>>, %arg4: memref<3x128x128xbf16, #tpu.memory_space<vmem>>, %arg5: memref<1x128xf32, #tpu.memory_space<vmem>>, %arg6: memref<1x16x128xf32, #tpu.memory_space<vmem>>) attributes {dimension_semantics = [#tpu.dimension_semantics<parallel>], iteration_bounds = array<i64: 2>, scalar_prefetch = 0 : i64, scratch_operands = 0 : i64, tpu.core_type = #tpu.core_type<tc>, window_params = [{transform_indices = @transform_0, window_bounds = array<i64: 1, 16, 128>}, {pipeline_mode = #tpu.pipeline_mode<synchronous>, transform_indices = @transform_1, window_bounds = array<i64: 3, 128, 128>}, {pipeline_mode = #tpu.pipeline_mode<synchronous>, transform_indices = @transform_2, window_bounds = array<i64: 1, 128>}, {pipeline_mode = #tpu.pipeline_mode<synchronous>, transform_indices = @transform_3, window_bounds = array<i64: 3, 128, 128>}, {pipeline_mode = #tpu.pipeline_mode<synchronous>, transform_indices = @transform_4, window_bounds = array<i64: 1, 128>}, {transform_indices = @transform_5, window_bounds = array<i64: 1, 16, 128>}]} {
    %c0 = arith.constant 0 : index
    %c0_0 = arith.constant 0 : index
    %c0_1 = arith.constant 0 : index
    %0 = vector.load %arg1[%c0, %c0_0, %c0_1] : memref<1x16x128xf32, #tpu.memory_space<vmem>>, vector<1x16x128xf32>
    %1 = vector.shape_cast %0 : vector<1x16x128xf32> to vector<16x128xf32>
    %c1_i32 = arith.constant 1 : i32
    %2 = tpu.dynamic_rotate %1 by %c1_i32 dim 0 : vector<16x128xf32>, i32 -> vector<16x128xf32>
    %c15_i32 = arith.constant 15 : i32
    %3 = tpu.dynamic_rotate %1 by %c15_i32 dim 0 : vector<16x128xf32>, i32 -> vector<16x128xf32>
    %4 = arith.truncf %2 : vector<16x128xf32> to vector<16x128xbf16>
    %c0_2 = arith.constant 0 : index
    %c0_3 = arith.constant 0 : index
    %c0_4 = arith.constant 0 : index
    %5 = vector.load %arg2[%c0_2, %c0_3, %c0_4] : memref<3x128x128xbf16, #tpu.memory_space<vmem>>, vector<1x128x128xbf16>
    %6 = vector.shape_cast %5 : vector<1x128x128xbf16> to vector<128x128xbf16>
    %cst = arith.constant dense<0.000000e+00> : vector<16x128xf32>
    %7 = tpu.matmul %4, %6, %cst {dimension_numbers = #tpu.dot_dimension_numbers<[1], [0], [0], [1], [0, 0, 1, 1], [], []>} : vector<16x128xbf16>, vector<128x128xbf16>, vector<16x128xf32> -> vector<16x128xf32>
    %8 = arith.truncf %1 : vector<16x128xf32> to vector<16x128xbf16>
    %c1 = arith.constant 1 : index
    %c0_5 = arith.constant 0 : index
    %c0_6 = arith.constant 0 : index
    %9 = vector.load %arg2[%c1, %c0_5, %c0_6] : memref<3x128x128xbf16, #tpu.memory_space<vmem>>, vector<1x128x128xbf16>
    %10 = vector.shape_cast %9 : vector<1x128x128xbf16> to vector<128x128xbf16>
    %cst_7 = arith.constant dense<0.000000e+00> : vector<16x128xf32>
    %11 = tpu.matmul %8, %10, %cst_7 {dimension_numbers = #tpu.dot_dimension_numbers<[1], [0], [0], [1], [0, 0, 1, 1], [], []>} : vector<16x128xbf16>, vector<128x128xbf16>, vector<16x128xf32> -> vector<16x128xf32>
    %12 = arith.addf %7, %11 : vector<16x128xf32>
    %13 = arith.truncf %3 : vector<16x128xf32> to vector<16x128xbf16>
    %c2 = arith.constant 2 : index
    %c0_8 = arith.constant 0 : index
    %c0_9 = arith.constant 0 : index
    %14 = vector.load %arg2[%c2, %c0_8, %c0_9] : memref<3x128x128xbf16, #tpu.memory_space<vmem>>, vector<1x128x128xbf16>
    %15 = vector.shape_cast %14 : vector<1x128x128xbf16> to vector<128x128xbf16>
    %cst_10 = arith.constant dense<0.000000e+00> : vector<16x128xf32>
    %16 = tpu.matmul %13, %15, %cst_10 {dimension_numbers = #tpu.dot_dimension_numbers<[1], [0], [0], [1], [0, 0, 1, 1], [], []>} : vector<16x128xbf16>, vector<128x128xbf16>, vector<16x128xf32> -> vector<16x128xf32>
    %17 = arith.addf %12, %16 : vector<16x128xf32>
    %c0_11 = arith.constant 0 : index
    %c0_12 = arith.constant 0 : index
    %18 = vector.load %arg3[%c0_11, %c0_12] : memref<1x128xf32, #tpu.memory_space<vmem>>, vector<1x128xf32>
    %19 = vector.broadcast %18 : vector<1x128xf32> to vector<16x128xf32>
    %20 = arith.addf %17, %19 : vector<16x128xf32>
    %cst_13 = arith.constant 0.000000e+00 : f32
    %21 = vector.broadcast %cst_13 : f32 to vector<16x128xf32>
    %22 = arith.maximumf %20, %21 : vector<16x128xf32>
    %23 = tpu.iota {dimensions = array<i32: 0>} : vector<16x1xi32>
    %c9_i32 = arith.constant 9 : i32
    %c0_i32 = arith.constant 0 : i32
    %24 = arith.cmpi eq, %c9_i32, %c0_i32 : i32
    %c1_i32_14 = arith.constant 1 : i32
    %25 = arith.select %24, %c1_i32_14, %c9_i32 : i32
    %26 = vector.broadcast %25 : i32 to vector<16x1xi32>
    %27 = arith.remsi %23, %26 : vector<16x1xi32>
    %c0_i32_15 = arith.constant 0 : i32
    %28 = vector.broadcast %c0_i32_15 : i32 to vector<16x1xi32>
    %29 = arith.cmpi ne, %27, %28 : vector<16x1xi32>
    %c0_i32_16 = arith.constant 0 : i32
    %30 = vector.broadcast %c0_i32_16 : i32 to vector<16x1xi32>
    %31 = arith.cmpi slt, %27, %30 : vector<16x1xi32>
    %c0_i32_17 = arith.constant 0 : i32
    %32 = arith.cmpi slt, %25, %c0_i32_17 : i32
    %33 = vector.broadcast %32 : i1 to vector<16x1xi1>
    %34 = vector.broadcast %33 : vector<16x1xi1> to vector<16x1xi1>
    %35 = arith.xori %31, %34 : vector<16x1xi1>
    %36 = arith.andi %35, %29 : vector<16x1xi1>
    %37 = vector.broadcast %25 : i32 to vector<16x1xi32>
    %38 = arith.addi %27, %37 : vector<16x1xi32>
    %39 = arith.select %36, %38, %27 : vector<16x1xi1>, vector<16x1xi32>
    %c8_i32 = arith.constant 8 : i32
    %40 = vector.broadcast %c8_i32 : i32 to vector<16x1xi32>
    %41 = arith.cmpi slt, %39, %40 : vector<16x1xi32>
    %c9_i32_18 = arith.constant 9 : i32
    %42 = vector.broadcast %c9_i32_18 : i32 to vector<16x1xi32>
    %43 = arith.cmpi slt, %23, %42 : vector<16x1xi32>
    %44 = arith.andi %41, %43 : vector<16x1xi1>
    %cst_19 = arith.constant 0.000000e+00 : f32
    %45 = vector.shape_cast %44 : vector<16x1xi1> to vector<16x1xi1>
    %46 = vector.broadcast %45 : vector<16x1xi1> to vector<16x128xi1>
    %47 = vector.broadcast %cst_19 : f32 to vector<16x128xf32>
    %48 = arith.select %46, %22, %47 : vector<16x128xi1>, vector<16x128xf32>
    %c1_i32_20 = arith.constant 1 : i32
    %49 = tpu.dynamic_rotate %48 by %c1_i32_20 dim 0 : vector<16x128xf32>, i32 -> vector<16x128xf32>
    %c15_i32_21 = arith.constant 15 : i32
    %50 = tpu.dynamic_rotate %48 by %c15_i32_21 dim 0 : vector<16x128xf32>, i32 -> vector<16x128xf32>
    %51 = arith.truncf %49 : vector<16x128xf32> to vector<16x128xbf16>
    %c0_22 = arith.constant 0 : index
    %c0_23 = arith.constant 0 : index
    %c0_24 = arith.constant 0 : index
    %52 = vector.load %arg4[%c0_22, %c0_23, %c0_24] : memref<3x128x128xbf16, #tpu.memory_space<vmem>>, vector<1x128x128xbf16>
    %53 = vector.shape_cast %52 : vector<1x128x128xbf16> to vector<128x128xbf16>
    %cst_25 = arith.constant dense<0.000000e+00> : vector<16x128xf32>
    %54 = tpu.matmul %51, %53, %cst_25 {dimension_numbers = #tpu.dot_dimension_numbers<[1], [0], [0], [1], [0, 0, 1, 1], [], []>} : vector<16x128xbf16>, vector<128x128xbf16>, vector<16x128xf32> -> vector<16x128xf32>
    %55 = arith.truncf %48 : vector<16x128xf32> to vector<16x128xbf16>
    %c1_26 = arith.constant 1 : index
    %c0_27 = arith.constant 0 : index
    %c0_28 = arith.constant 0 : index
    %56 = vector.load %arg4[%c1_26, %c0_27, %c0_28] : memref<3x128x128xbf16, #tpu.memory_space<vmem>>, vector<1x128x128xbf16>
    %57 = vector.shape_cast %56 : vector<1x128x128xbf16> to vector<128x128xbf16>
    %cst_29 = arith.constant dense<0.000000e+00> : vector<16x128xf32>
    %58 = tpu.matmul %55, %57, %cst_29 {dimension_numbers = #tpu.dot_dimension_numbers<[1], [0], [0], [1], [0, 0, 1, 1], [], []>} : vector<16x128xbf16>, vector<128x128xbf16>, vector<16x128xf32> -> vector<16x128xf32>
    %59 = arith.addf %54, %58 : vector<16x128xf32>
    %60 = arith.truncf %50 : vector<16x128xf32> to vector<16x128xbf16>
    %c2_30 = arith.constant 2 : index
    %c0_31 = arith.constant 0 : index
    %c0_32 = arith.constant 0 : index
    %61 = vector.load %arg4[%c2_30, %c0_31, %c0_32] : memref<3x128x128xbf16, #tpu.memory_space<vmem>>, vector<1x128x128xbf16>
    %62 = vector.shape_cast %61 : vector<1x128x128xbf16> to vector<128x128xbf16>
    %cst_33 = arith.constant dense<0.000000e+00> : vector<16x128xf32>
    %63 = tpu.matmul %60, %62, %cst_33 {dimension_numbers = #tpu.dot_dimension_numbers<[1], [0], [0], [1], [0, 0, 1, 1], [], []>} : vector<16x128xbf16>, vector<128x128xbf16>, vector<16x128xf32> -> vector<16x128xf32>
    %64 = arith.addf %59, %63 : vector<16x128xf32>
    %c0_34 = arith.constant 0 : index
    %c0_35 = arith.constant 0 : index
    %65 = vector.load %arg5[%c0_34, %c0_35] : memref<1x128xf32, #tpu.memory_space<vmem>>, vector<1x128xf32>
    %66 = vector.broadcast %65 : vector<1x128xf32> to vector<16x128xf32>
    %67 = arith.addf %64, %66 : vector<16x128xf32>
    %68 = arith.addf %67, %1 : vector<16x128xf32>
    %cst_36 = arith.constant 0.000000e+00 : f32
    %69 = vector.broadcast %cst_36 : f32 to vector<16x128xf32>
    %70 = arith.maximumf %68, %69 : vector<16x128xf32>
    %c0_37 = arith.constant 0 : index
    %c0_38 = arith.constant 0 : index
    %c0_39 = arith.constant 0 : index
    %71 = vector.load %arg6[%c0_37, %c0_38, %c0_39] : memref<1x16x128xf32, #tpu.memory_space<vmem>>, vector<1x16x128xf32>
    %72 = vector.shape_cast %71 : vector<1x16x128xf32> to vector<16x128xf32>
    %73 = vector.shape_cast %70 : vector<16x128xf32> to vector<1x16x128xf32>
    tpu.vector_store %arg6[%c0_37, %c0_38, %c0_39], %73 {strides = array<i32>} : memref<1x16x128xf32, #tpu.memory_space<vmem>>, vector<1x16x128xf32>,
    return
  }
  func.func @transform_0(%arg0: i32) -> (i32, i32, i32) {
    %c0_i32 = arith.constant 0 : i32
    %c0_i32_0 = arith.constant 0 : i32
    %c0_i32_1 = arith.constant 0 : i32
    return %arg0, %c0_i32, %c0_i32_0 : i32, i32, i32
  }
  func.func @transform_1(%arg0: i32) -> (i32, i32, i32) {
    %c0_i32 = arith.constant 0 : i32
    %c0_i32_0 = arith.constant 0 : i32
    %c0_i32_1 = arith.constant 0 : i32
    %c0_i32_2 = arith.constant 0 : i32
    return %c0_i32, %c0_i32_0, %c0_i32_1 : i32, i32, i32
  }
  func.func @transform_2(%arg0: i32) -> (i32, i32) {
    %c0_i32 = arith.constant 0 : i32
    %c0_i32_0 = arith.constant 0 : i32
    %c0_i32_1 = arith.constant 0 : i32
    return %c0_i32, %c0_i32_0 : i32, i32
  }
  func.func @transform_3(%arg0: i32) -> (i32, i32, i32) {
    %c0_i32 = arith.constant 0 : i32
    %c0_i32_0 = arith.constant 0 : i32
    %c0_i32_1 = arith.constant 0 : i32
    %c0_i32_2 = arith.constant 0 : i32
    return %c0_i32, %c0_i32_0, %c0_i32_1 : i32, i32, i32
  }
  func.func @transform_4(%arg0: i32) -> (i32, i32) {
    %c0_i32 = arith.constant 0 : i32
    %c0_i32_0 = arith.constant 0 : i32
    %c0_i32_1 = arith.constant 0 : i32
    return %c0_i32, %c0_i32_0 : i32, i32
  }
  func.func @transform_5(%arg0: i32) -> (i32, i32, i32) {
    %c0_i32 = arith.constant 0 : i32
    %c0_i32_0 = arith.constant 0 : i32
    %c0_i32_1 = arith.constant 0 : i32
    return %arg0, %c0_i32, %c0_i32_0 : i32, i32, i32
  }
}

</mosaic_0001>

<bundles_post_ra>
// kernel: tpu_custom_call.1
= control target key start
LH: loop header
LB: loop body
LE: loop exit
PB: predicated region body
PF: predicated region fallthrough
CT: control target
= control target key end

     0   :  { %10 = vsyncpa [#allocation3], 0  ;;  %s1736_s0 = inlined_call_operand.hbm [shape: f32[2,16,128], index: 0, kind: input, shape index: {}]   ;;  %s1737_s1 = inlined_call_operand.hbm [shape: bf16[3,128,128], index: 1, kind: input, shape index: {}]   ;;  %s1738_s2 = inlined_call_operand.vmem [shape: f32[1,128], index: 2, kind: input, shape index: {}]   ;;  %s1739_s3 = inlined_call_operand.hbm [shape: bf16[3,128,128], index: 3, kind: input, shape index: {}]   ;;  %s1740_s4 = inlined_call_operand.vmem [shape: f32[1,128], index: 4, kind: input, shape index: {}]   ;;  %s1741_s5 = inlined_call_operand.hbm [shape: f32[2,16,128], index: 5, kind: output, shape index: {}]  }
   0x1   :  { %12 = vsyncpa [#allocation3 + $0x1], 0 }
   0x2   :  { %13 = vsyncpa [#allocation6], 0 }
   0x3   :  { %14 = vsyncpa [#allocation4], 0 }
   0x4   :  { %16 = vsyncpa [#allocation4 + $0x1], 0  ;;  %s1531_s18 = smov 0   ;;  %s1533_s19 = smov 0  }
   0x5   :  { %s1535_s20 = smov 0   ;;  %s1537_s21 = smov 0  }
   0x6 LB: > { %s1552_s22 = sadd.s32 4294967295, %s1490_s21   ;;  %s991_s23 = sadd.s32 4294967294, %s1490_s21   ;;  %s1490_s21 = sphi %s1537_s21, %s1751_s21   ;;  %s1486_s20 = sphi %s1535_s20, %s1750_s20   ;;  %s1482_s19 = sphi %s1533_s19, %s1749_s19   ;;  %s1478_s18 = sphi %s1531_s18, %s1748_s18  }
   0x7   : > { %p42_p0 = scmp.ne.s32.totalorder %s1482_s19, %s1478_s18  ;;  %p43_p1 = scmp.eq.s32.totalorder %s1552_s22, 0 }
   0x8   : > { %p150_p2 = scmp.eq.s32.totalorder %s1552_s22, 1  ;;  %p156_p3 = scmp.eq.s32.totalorder %s991_s23, 1 }
   0x9   : > { %p1561_p4 = por %p43_p1, %p42_p0  ;;  %p992_p5 = scmp.ge.s32.totalorder %s1490_s21, 1 }
   0xa   : > { %p1566_p6 = por %p156_p3, %p42_p0  ;;  %p163_p7 = scmp.lt.s32.totalorder %s1490_s21, 3 }
   0xb   : > { %s174_s28 = sshll.u32 %s1737_s1, 4  ;;  %s1492_s30 = smov [#allocation5]   ;;  %s175_s28 = int_to_ptr.hbm [resolvable:$true] %s174_s28 }
   0xc   : > { %p1574_p8 = pnand %p992_p5, %p163_p7  ;;  %s176_s6 = sshll.u32 %s1492_s30, 4  ;;  %s177_s6 = int_to_ptr.vmem [resolvable:$true] %s176_s6 }
   0xd   : > { %s191_s9 = sshll.u32 %s1739_s3, 4  ;;  %s1493_s10 = smov 64   ;;  %s192_s9 = int_to_ptr.hbm [resolvable:$true] %s191_s9 }
   0xe   : > { %p1266_p9 = pneg %p1574_p8  ;;  %s1494_s11 = smov 4  }
   0xf   : > { %s1495_s12 = smov [#allocation7]   ;;  %s1587_s14 = sadd.s32 1, %s1490_s21  }
  0x10   : > { %p1267_p10 = pnand %p1266_p9, %p43_p1  ;;  %s193_s13 = sshll.u32 %s1495_s12, 4  ;;  %s194_s13 = int_to_ptr.vmem [resolvable:$true] %s193_s13 }
  0x11   : > { %s29_s15 = sadd.s32 1, %s1486_s20  ;;  %s26_s16 = ssub.s32 %s1490_s21, %s1587_s14 }
  0x12   : > { %1269 = dma.hbm_to_vmem [thread:$0]  (!%p1267_p10), %s175_s28, 3072, %s177_s6, [#allocation6], %s1493_s10, %s1493_s10, %s1494_s11  }
  0x13   : > { %1272 = dma.hbm_to_vmem [thread:$0]  (!%p1267_p10), %s192_s9, 3072, %s194_s13, [#allocation6], %s1493_s10, %s1493_s10, %s1494_s11  }
  0x14   : > { %p36_p12 = scmp.ne.s32.totalorder %s1486_s20, %s1482_s19  ;;  %p27_p13 = scmp.eq.s32.totalorder %s26_s16, 0 }
  0x15   : > { %p37_p0 = scmp.eq.s32.totalorder %s1490_s21, 0  ;;  %p1283_p5 = scmp.lt.s32.totalorder %s1490_s21, 2 }
  0x16   : > { %p1597_p3 = por %p150_p2, %p36_p12  ;;  %s210_s26 = sand.u32 1, %s1486_s20  }
  0x17   : > { %s1603_s23 = scalar_select %p27_p13, %s1486_s20, %s29_s15  }
  0x18   : > { %p38_p7 = por %p37_p0, %p36_p12  ;;  %s996_s27 = sshll.u32 %s210_s26, 4 }
  0x19   : > { %s1204_s28 = sshll.u32 %s1490_s21, 4  ;;  %s214_s8 = scalar_lea.vmem [#allocation2], %s996_s27 }
  0x1a   : > { %s219_s7 = scalar_lea.hbm %s1736_s0, %s1204_s28  ;;  %s222_s9 = sshll.u32 %s214_s8, 4  ;;  %s223_s9 = int_to_ptr.vmem [resolvable:$true] %s222_s9 }
  0x1b   : > { %s220_s10 = sshll.u32 %s219_s7, 4  ;;  %p1610_p2 = pnand %p1283_p5, %p38_p7  ;;  %s221_s10 = int_to_ptr.hbm [resolvable:$true] %s220_s10 }
  0x1c   : > { %s211_s12 = scalar_lea.sflag [#allocation3], %s210_s26  ;;  %s1390_s13 = sshra.s32 %s221_s10, 4  ;;  %s1391_s13 = int_to_ptr.hbm [resolvable:$true] %s1390_s13 }
  0x1d   : > { %s1392_s15 = scalar_lea.hbm %s1391_s13, 16  ;;  %p1394_p10 = pneg %p1610_p2 }
  0x1e   : > { %p1393_p9 = scmp.ne.s32.totalorder %s1391_s13, %s1392_s15  ;;  %s1397_s28 = scalar_lea.hbm %s1736_s0, 32 }
  0x1f   : > { %p1398_p0 = scmp.lt.s32.totalorder %s1391_s13, %s1736_s0  ;;  %p1399_p5 = scmp.lt.s32.totalorder %s1397_s28, %s1392_s15 }
  0x20   : > { %p1395_p12 = pnand %p1394_p10, %p1393_p9 }
  0x21   : > { %p1400_p7 = por %p1399_p5, %p1398_p0 }
  0x22   : > { %p1396_p13 = pneg %p1395_p12 }
  0x24   : > { %p1401_p11 = pnand %p1400_p7, %p1396_p13 }
  0x26   : > { %1404 = shalt.err (!%p1401_p11)
}
  0x27   : > { %s1496_s26 = smov 128   ;;  %s1497_s7 = smov 8  }
  0x28   : > { %1276 = dma.hbm_to_vmem [thread:$0]  (!%p1610_p2), %s221_s10, 256, %s223_s9, %s211_s12, %s1496_s26, %s1496_s26, %s1497_s7  }
  0x29   : > { %234 = sbr.rel (%p1574_p8) target bundleno = 385 (0x181), region = 40  ;;  %s1627_s8 = sand.u32 (!%p1574_p8), 1, %s1482_s19  }
  0x2a   : > { %s1000_s13 = sshll.u32 (!%p1574_p8), %s1627_s8, 4  ;;  %s237_s15 = scalar_lea.sflag (!%p1574_p8), [#allocation3], %s1627_s8 }
  0x2b   : > { %s1633_s16 = scalar_lea.vmem (!%p1574_p8), [#allocation2], %s1000_s13 }
  0x2e   : > { %1465 = dma.done.wait (%p1561_p4), %s237_s15, 256  }
  0x2f   : > { %1467 = vsyncadd (%p1561_p4), %s237_s15, 4294967040 }
  0x30   : > { %1469 = dma.done.wait (%p43_p1), [#allocation6], 6144  }
  0x31   : > { %1471 = vsyncadd (%p43_p1), [#allocation6], 4294961152  ;;  %v1220_v0 = vld [vmem:[#allocation5 + $0x78] sm:$0xff]  ;;  %v1219_v3 = vld [vmem:[#allocation5 + $0x70] sm:$0xff]  ;;  %v282_v17 = vlaneseq  ;;  %s1253_s11 = sshll.u32 %s1552_s22, 4  ;;  %s277_s30 = scalar_lea.vmem [#allocation8], %s1000_s13 }
  0x32   : > { %v1212_v1 = vld [vmem:[#allocation5 + $0x38] sm:$0xff]  ;;  %375 = vmatpush.bf16.msra.mxu0 %v1220_v0  ;;  %v1211_v4 = vld [vmem:[#allocation5 + $0x30] sm:$0xff]  ;;  %v1218_v6 = vld [vmem:[#allocation5 + $0x68] sm:$0xff]  ;;  %s895_s28 = scalar_lea.hbm %s1741_s5, %s1253_s11  ;;  %s896_s6 = sshll.u32 %s277_s30, 4  ;;  %s897_s6 = int_to_ptr.vmem [resolvable:$true] %s896_s6 }
  0x33   : > { %v1228_v2 = vld [vmem:[#allocation5 + $0xb8] sm:$0xff]  ;;  %437 = vmatpush.bf16.msra.mxu1 %v1212_v1  ;;  %v1227_v5 = vld [vmem:[#allocation5 + $0xb0] sm:$0xff]  ;;  %v1210_v7 = vld [vmem:[#allocation5 + $0x28] sm:$0xff]  ;;  %v1649_v23 = vshrl.u32 %v282_v17, 7  ;;  %s898_s26 = sshll.u32 %s895_s28, 4  ;;  %s884_s22 = scalar_lea.sflag [#allocation4], %s1627_s8  ;;  %s899_s26 = int_to_ptr.hbm [resolvable:$true] %s898_s26 }
  0x34   : > { %517 = vmatpush.bf16.msra.mxu2 %v1228_v2  ;;  %v1226_v8 = vld [vmem:[#allocation5 + $0xa8] sm:$0xff]  ;;  %v1244_v9 = vld [vmem:[#allocation7 + $0x78] sm:$0xff]  ;;  %v1217_v10 = vld [vmem:[#allocation5 + $0x60] sm:$0xff]  ;;  %s1434_s7 = sshra.s32 %s899_s26, 4  ;;  %s1440_s24 = scalar_lea.hbm %s1741_s5, 32  ;;  %s1435_s7 = int_to_ptr.hbm [resolvable:$true] %s1434_s7 }
  0x35   : > { %v1209_v11 = vld [vmem:[#allocation5 + $0x20] sm:$0xff]  ;;  %713 = vmatpush.bf16.msra.mxu3 %v1244_v9  ;;  %v1243_v13 = vld [vmem:[#allocation7 + $0x70] sm:$0xff]  ;;  %v1216_v14 = vld [vmem:[#allocation5 + $0x58] sm:$0xff]  ;;  %vm284_vm0 = vcmp.lt.s32.totalorder %v1649_v23, 1  ;;  %vm289_vm1 = vcmp.lt.s32.totalorder %v1649_v23, 7  ;;  %v1668_v43 = vadd.s32 8, %v1649_v23  ;;  %p1441_p11 = scmp.lt.s32.totalorder %s1435_s7, %s1741_s5 }
  0x36   : > { %376 = vmatpush.bf16.msra.mxu0 %v1219_v3  ;;  %v1225_v12 = vld [vmem:[#allocation5 + $0xa0] sm:$0xff]  ;;  %v1208_v15 = vld [vmem:[#allocation5 + $0x18] sm:$0xff]  ;;  %v1215_v18 = vld [vmem:[#allocation5 + $0x50] sm:$0xff]  ;;  %v545_v44 = vand.u32 65535, %v1649_v23  ;;  %v546_v46 = vshrl.u32 %v1649_v23, 16  ;;  %s1436_s15 = scalar_lea.hbm %s1435_s7, 16 }
  0x37   : > { %438 = vmatpush.bf16.msra.mxu1 %v1211_v4  ;;  %v1224_v16 = vld [vmem:[#allocation5 + $0x98] sm:$0xff]  ;;  %v1207_v19 = vld [vmem:[#allocation5 + $0x10] sm:$0xff]  ;;  %v1214_v24 = vld [vmem:[#allocation5 + $0x48] sm:$0xff]  ;;  %v574_v45 = vand.u32 65535, %v1668_v43  ;;  %v575_v47 = vshrl.u32 %v1668_v43, 16  ;;  %vm613_vm13 = vcmp.lt.s32.totalorder %v1668_v43, 9  ;;  %p1437_p1 = scmp.ne.s32.totalorder %s1435_s7, %s1436_s15  ;;  %p1442_p2 = scmp.lt.s32.totalorder %s1440_s24, %s1436_s15 }
  0x38   : > { %518 = vmatpush.bf16.msra.mxu2 %v1227_v5  ;;  %v1223_v20 = vld [vmem:[#allocation5 + $0x90] sm:$0xff]  ;;  %v1647_v22 = vld [vmem:[%s1633_s16 + $0x8] sm:$0xff]  ;;  %v1213_v31 = vld [vmem:[#allocation5 + $0x40] sm:$0xff]  ;;  %v1674_v49 = vmul.u32 58254, %v545_v44  ;;  %v550_v58 = vmul.u32 14564, %v546_v46  ;;  %v548_v60 = vmul.u32 14564, %v545_v44 }
  0x39   : > { %714 = vmatpush.bf16.msra.mxu3 %v1243_v13  ;;  %v1644_v21 = vld [vmem:[%s1633_s16] sm:$0xff]  ;;  %v1206_v25 = vld [vmem:[#allocation5 + $0x8] sm:$0xff]  ;;  %v281_v27 = vrot.slane %v1647_v22, 7  ;;  %v288_v30 = vrot.slane %v1647_v22, 1  ;;  %v1236_v38 = vld [vmem:[#allocation7 + $0x38] sm:$0xff]  ;;  %v578_v48 = vmul.u32 58254, %v574_v45  ;;  %p1438_p4 = pnand %p1437_p1, %p1597_p3  ;;  %p1443_p9 = por %p1442_p2, %p1441_p11 }
  0x3a   : > { %377 = vmatpush.bf16.msra.mxu0 %v1218_v6  ;;  %v280_v26 = vrot.slane %v1644_v21, 7  ;;  %v1222_v28 = vld [vmem:[#allocation5 + $0x88] sm:$0xff]  ;;  %v287_v29 = vrot.slane %v1644_v21, 1  ;;  %v1205_v32 = vld [vmem:[#allocation5] sm:$0xff]  ;;  %v1252_v39 = vld [vmem:[#allocation7 + $0xb8] sm:$0xff]  ;;  %v309_v40 = vpack.c.bf16 %v1647_v22, %v1644_v21  ;;  %v577_v53 = vmul.u32 14564, %v574_v45 }
  0x3b   : > { %439 = vmatpush.bf16.msra.mxu1 %v1210_v7  ;;  %v1221_v35 = vld [vmem:[#allocation5 + $0x80] sm:$0xff]  ;;  %v1242_v50 = vld [vmem:[#allocation7 + $0x68] sm:$0xff]  ;;  %v1235_v51 = vld [vmem:[#allocation7 + $0x30] sm:$0xff]  ;;  %v1676_v54 = vmul.u32 14564, %v575_v47  ;;  %v581_v55 = vshll.u32 %v578_v48, 16  ;;  %v552_v61 = vshll.u32 %v1674_v49, 16  ;;  %p1439_p8 = pneg %p1438_p4 }
  0x3c   : > { %519 = vmatpush.bf16.msra.mxu2 %v1226_v8  ;;  %v285_v33 = vsel %vm284_vm0, %v280_v26, %v281_v27  ;;  %v286_v34 = vsel %vm284_vm0, %v281_v27, %v280_v26  ;;  %v290_v36 = vsel %vm289_vm1, %v287_v29, %v288_v30  ;;  %v291_v37 = vsel %vm289_vm1, %v288_v30, %v287_v29  ;;  %v1251_v52 = vld [vmem:[#allocation7 + $0xb0] sm:$0xff]  ;;  %v1241_v56 = vld [vmem:[#allocation7 + $0x60] sm:$0xff]  ;;  %v1234_v57 = vld [vmem:[#allocation7 + $0x28] sm:$0xff] }
  0x3d   : > { %v292_v41 = vpack.c.bf16 %v285_v33, %v286_v34  ;;  %v451_v42 = vpack.c.bf16 %v291_v37, %v290_v36  ;;  %715 = vmatpush.bf16.msra.mxu3 %v1242_v50  ;;  %v1250_v59 = vld [vmem:[#allocation7 + $0xa8] sm:$0xff]  ;;  %v583_v62 = vshll.u32 %v1676_v54, 16  ;;  %vm585_vm2 = vc.u32 %v577_v53, %v581_v55  ;;  %v1240_v3 = vld [vmem:[#allocation7 + $0x58] sm:$0xff]  ;;  %v1233_v4 = vld [vmem:[#allocation7 + $0x20] sm:$0xff]  ;;  %p1444_p10 = pnand %p1443_p9, %p1439_p8 }
  0x3e   : > { %378 = vmatpush.bf16.msra.mxu0 %v1217_v10  ;;  %v587_v63 = vadd.s32 %v581_v55, %v577_v53  ;;  %v554_v0 = vshll.u32 %v550_v58, 16  ;;  %vm556_vm3 = vc.u32 %v548_v60, %v552_v61  ;;  %v558_v1 = vadd.s32 %v552_v61, %v548_v60  ;;  %v1249_v5 = vld [vmem:[#allocation7 + $0xa0] sm:$0xff]  ;;  %v1248_v13 = vld [vmem:[#allocation7 + $0x98] sm:$0xff]  ;;  %v1230_v30 = vld [vmem:[#allocation7 + $0x8] sm:$0xff] }
  0x3f   : > { %440 = vmatpush.bf16.msra.mxu1 %v1209_v11  ;;  %v580_v2 = vmul.u32 58254, %v575_v47  ;;  %v1498_v6 = vmov 0   ;;  %v551_v8 = vmul.u32 58254, %v546_v46  ;;  %v1239_v11 = vld [vmem:[#allocation7 + $0x50] sm:$0xff]  ;;  %v582_v17 = vshrl.u32 %v578_v48, 16  ;;  %v1237_v29 = vld [vmem:[#allocation7 + $0x40] sm:$0xff] }
  0x40   : > { %520 = vmatpush.bf16.msra.mxu2 %v1225_v12  ;;  %v586_v7 = vsel %vm585_vm2, 1, %v1498_v6  ;;  %vm589_vm4 = vc.u32 %v587_v63, %v583_v62  ;;  %v557_v9 = vsel %vm556_vm3, 1, %v1498_v6  ;;  %vm560_vm5 = vc.u32 %v558_v1, %v554_v0  ;;  %v1232_v12 = vld [vmem:[#allocation7 + $0x18] sm:$0xff]  ;;  %v1245_v36 = vld [vmem:[#allocation7 + $0x80] sm:$0xff] }
  0x41   : > { %716 = vmatpush.bf16.msra.mxu3 %v1241_v56  ;;  %v588_v10 = vadd.s32 %v586_v7, %v580_v2  ;;  %v584_v27 = vshrl.u32 %v1676_v54, 16  ;;  %v1328_v50 = vld [vmem:[%s1738_s2] ss:$0 sm:$0xff] }
  0x42   : > { %379 = vmatpush.bf16.msra.mxu0 %v1216_v14  ;;  %v590_v14 = vsel %vm589_vm4, 1, %v1498_v6 }
  0x43   : > { %441 = vmatpush.bf16.msra.mxu1 %v1208_v15  ;;  %v559_v15 = vadd.s32 %v557_v9, %v551_v8 }
  0x44   : > { %521 = vmatpush.bf16.msra.mxu2 %v1224_v16  ;;  %v561_v16 = vsel %vm560_vm5, 1, %v1498_v6 }
  0x45   : > { %717 = vmatpush.bf16.msra.mxu3 %v1240_v3  ;;  %v563_v26 = vadd.s32 %v561_v16, %v559_v15  ;;  %v1329_v16 = vld [vmem:[%s1740_s4] ss:$0 sm:$0xff] }
  0x46   : > { %380 = vmatpush.bf16.msra.mxu0 %v1215_v18  ;;  %v592_v18 = vadd.s32 %v590_v14, %v588_v10 }
  0x47   : > { %442 = vmatpush.bf16.msra.mxu1 %v1207_v19  ;;  %v1238_v19 = vld [vmem:[#allocation7 + $0x48] sm:$0xff] }
  0x48   : > { %522 = vmatpush.bf16.msra.mxu2 %v1223_v20  ;;  %v1231_v20 = vld [vmem:[#allocation7 + $0x10] sm:$0xff] }
  0x49   : > { %718 = vmatpush.bf16.msra.mxu3 %v1239_v11 }
  0x4a   : > { %381 = vmatpush.bf16.msra.mxu0 %v1214_v24  ;;  %v1247_v24 = vld [vmem:[#allocation7 + $0x90] sm:$0xff] }
  0x4b   : > { %443 = vmatpush.bf16.msra.mxu1 %v1206_v25  ;;  %v553_v25 = vshrl.u32 %v1674_v49, 16 }
  0x4c   : > { %523 = vmatpush.bf16.msra.mxu2 %v1222_v28  ;;  %v593_v28 = vadd.s32 %v592_v18, %v582_v17 }
  0x4d   : > { %719 = vmatpush.bf16.msra.mxu3 %v1238_v19  ;;  %v564_v33 = vadd.s32 %v563_v26, %v553_v25 }
  0x4e   : > { %382 = vmatpush.bf16.msra.mxu0 %v1213_v31  ;;  %v1246_v31 = vld [vmem:[#allocation7 + $0x88] sm:$0xff]  ;;  %v594_v34 = vadd.s32 %v593_v28, %v584_v27 }
  0x4f   : > { %444 = vmatpush.bf16.msra.mxu1 %v1205_v32  ;;  %v555_v32 = vshrl.u32 %v550_v58, 16 }
  0x50   : > { %524 = vmatpush.bf16.msra.mxu2 %v1221_v35  ;;  %v1229_v35 = vld [vmem:[#allocation7] sm:$0xff] }
  0x51   : > { %383 = vmatmul.bf16.vlgmr.msra.gmra.mxu0 %v309_v40  ;;  %720 = vmatpush.bf16.msra.mxu3 %v1237_v29  ;;  %v565_v37 = vadd.s32 %v564_v33, %v555_v32 }
  0x52   : > { %775 = vmatpush.bf16.msrb.mxu0 %v1236_v38  ;;  %445 = vmatmul.bf16.vlgmr.msra.gmra.mxu1 %v292_v41  ;;  %v595_v38 = vshrl.u32 %v594_v34, 3 }
  0x53   : > { %855 = vmatpush.bf16.msrb.mxu1 %v1252_v39  ;;  %525 = vmatmul.bf16.vlgmr.msra.gmra.mxu2 %v451_v42  ;;  %v566_v39 = vshrl.u32 %v565_v37, 3 }
  0x54   : > { %v596_v40 = vmul.u32 9, %v595_v38 }
  0x55   : > { %v567_v41 = vmul.u32 9, %v566_v39 }
  0x56   : > { %776 = vmatpush.bf16.msrb.mxu0 %v1235_v51  ;;  %v597_v45 = vsub.s32 %v1668_v43, %v596_v40 }
  0x57   : > { %856 = vmatpush.bf16.msrb.mxu1 %v1251_v52  ;;  %v568_v47 = vsub.s32 %v1649_v23, %v567_v41 }
  0x58   : > { %vm601_vm6 = vcmp.ne.s32.totalorder %v597_v45, 0  ;;  %vm603_vm7 = vcmp.lt.s32.totalorder %v597_v45, 0  ;;  %v607_v51 = vadd.s32 9, %v597_v45 }
  0x59   : > { %vm600_vm8 = vcmp.ne.s32.totalorder %v568_v47, 0  ;;  %vm602_vm9 = vcmp.lt.s32.totalorder %v568_v47, 0  ;;  %vm605_vm10 = vmand %vm603_vm7, %vm601_vm6  ;;  %v606_v52 = vadd.s32 9, %v568_v47 }
  0x5a   : > { %777 = vmatpush.bf16.msrb.mxu0 %v1234_v57  ;;  %vm604_vm11 = vmand %vm602_vm9, %vm600_vm8  ;;  %v609_v56 = vsel %vm605_vm10, %v607_v51, %v597_v45 }
  0x5b   : > { %857 = vmatpush.bf16.msrb.mxu1 %v1250_v59  ;;  %v608_v58 = vsel %vm604_vm11, %v606_v52, %v568_v47  ;;  %vm611_vm12 = vcmp.lt.s32.totalorder %v609_v56, 8 }
  0x5c   : > { %vm610_vm14 = vcmp.lt.s32.totalorder %v608_v58, 8  ;;  %vm615_vm15 = vmand %vm611_vm12, %vm613_vm13 }
  0x5d   : > { %vm1132_vm2 = vmpackc.low %vm615_vm15, %vm610_vm14 }
  0x5e   : > { %778 = vmatpush.bf16.msrb.mxu0 %v1233_v4 }
  0x5f   : > { %858 = vmatpush.bf16.msrb.mxu1 %v1249_v5 }
  0x62   : > { %779 = vmatpush.bf16.msrb.mxu0 %v1232_v12 }
  0x63   : > { %859 = vmatpush.bf16.msrb.mxu1 %v1248_v13 }
  0x66   : > { %780 = vmatpush.bf16.msrb.mxu0 %v1231_v20 }
  0x67   : > { %860 = vmatpush.bf16.msrb.mxu1 %v1247_v24 }
  0x6a   : > { %781 = vmatpush.bf16.msrb.mxu0 %v1230_v30 }
  0x6b   : > { %861 = vmatpush.bf16.msrb.mxu1 %v1246_v31 }
  0x6e   : > { %782 = vmatpush.bf16.msrb.mxu0 %v1229_v35 }
  0x6f   : > { %862 = vmatpush.bf16.msrb.mxu1 %v1245_v36 }
  0xce   : > { %v384_v42 = vpop.f32.mrf.mxu0 }
  0xcf   : > { %v446_v44 = vpop.f32.mrf.mxu1 }
  0xd0   : > { %v447_v46 = vadd.f32 %v446_v44, %v384_v42 }
  0xd6   : > { %v526_v48 = vpop.f32.mrf.mxu2  ;;  %v386_v53 = vpop.f32.mrf.mxu0 }
  0xd7   : > { %v531_v49 = vadd.f32 %v526_v48, %v447_v46  ;;  %v448_v54 = vpop.f32.mrf.mxu1 }
  0xd8   : > { %v449_v57 = vadd.f32 %v448_v54, %v386_v53 }
  0xd9   : > { %v537_v55 = vadd.f32 %v1328_v50, %v531_v49 }
  0xdb   : > { %v539_v60 = vmax.f32 %v537_v55, 0.0 }
  0xdd   : > { %v620_v0 = vsel %vm610_vm14, %v539_v60, 0.0 }
  0xde   : > { %v528_v59 = vpop.f32.mrf.mxu2  ;;  %v622_v3 = vrot.slane %v620_v0, 7  ;;  %v626_v5 = vrot.slane %v620_v0, 1 }
  0xdf   : > { %v532_v61 = vadd.f32 %v528_v59, %v449_v57 }
  0xe1   : > { %v538_v62 = vadd.f32 %v1328_v50, %v532_v61 }
  0xe3   : > { %v540_v63 = vmax.f32 %v538_v62, 0.0 }
  0xe5   : > { %v621_v1 = vsel %vm615_vm15, %v540_v63, 0.0  ;;  %v1133_v2 = vpack.c.bf16 %v540_v63, %v539_v60 }
  0xe6   : > { %v623_v4 = vrot.slane %v621_v1, 7  ;;  %v627_v6 = vrot.slane %v621_v1, 1 }
  0xe7   : > { %1134 = vmatmul.msk.bf16.vlgmr.msra.gmra.mxu3 %vm1132_vm2, %v1133_v2 }
  0xe8   : > { %v624_v7 = vsel %vm284_vm0, %v622_v3, %v623_v4  ;;  %v625_v43 = vsel %vm284_vm0, %v623_v4, %v622_v3  ;;  %v628_v8 = vsel %vm289_vm1, %v626_v5, %v627_v6  ;;  %v629_v9 = vsel %vm289_vm1, %v627_v6, %v626_v5 }
  0xe9   : > { %v630_v10 = vpack.c.bf16 %v624_v7, %v625_v43  ;;  %v789_v11 = vpack.c.bf16 %v629_v9, %v628_v8 }
  0xeb   : > { %783 = vmatmul.bf16.vlgmr.msrb.gmra.mxu0 %v630_v10  ;;  %863 = vmatmul.bf16.vlgmr.msrb.gmra.mxu1 %v789_v11 }
 0x168   : > { %v784_v12 = vpop.f32.mrf.mxu0  ;;  %v864_v13 = vpop.f32.mrf.mxu1 }
 0x16a   : > { %v722_v14 = vpop.f32.mrf.mxu3 }
 0x16b   : > { %v785_v15 = vadd.f32 %v784_v12, %v722_v14 }
 0x16d   : > { %v869_v17 = vadd.f32 %v864_v13, %v785_v15 }
 0x16f   : > { %v875_v18 = vadd.f32 %v1329_v16, %v869_v17 }
 0x170   : > { %v786_v23 = vpop.f32.mrf.mxu0  ;;  %v866_v26 = vpop.f32.mrf.mxu1 }
 0x171   : > { %v877_v19 = vadd.f32 %v875_v18, %v1644_v21 }
 0x172   : > { %v724_v20 = vpop.f32.mrf.mxu3 }
 0x173   : > { %v879_v24 = vmax.f32 %v877_v19, 0.0  ;;  %v787_v25 = vadd.f32 %v786_v23, %v724_v20 }
 0x175   : > { %881 = vst [vmem:[%s277_s30] sm:$0xff] %v879_v24  ;;  %v870_v27 = vadd.f32 %v866_v26, %v787_v25 }
 0x177   : > { %v876_v28 = vadd.f32 %v1329_v16, %v870_v27 }
 0x179   : > { %v878_v21 = vadd.f32 %v876_v28, %v1647_v22 }
 0x17b   : > { %v880_v29 = vmax.f32 %v878_v21, 0.0 }
 0x17d   : > { %882 = vst [vmem:[%s277_s30 + $0x8] sm:$0xff] %v880_v29 }
 0x17e   : > { %1447 = shalt.err (!%p1444_p10)
}
 0x17f   : > { %s1499_s8 = smov 128   ;;  %s1500_s10 = smov 8  }
 0x180   : > { %1264 = dma.vmem_to_hbm [thread:$0]  (%p1597_p3), %s897_s6, 256, %s899_s26, %s884_s22, %s1499_s8, %s1499_s8, %s1500_s10  }
 0x181 PF: > { %s913_s11 = sand.u32 1, %s1478_s18   ;;  %p1747_p12 = scmp.ge.s32.totalorder %s1490_s21, 2 }
 0x182   : > { %s914_s12 = scalar_lea.sflag [#allocation4], %s913_s11 }
 0x183   : > { %p1278_p13 = pnand %p1747_p12, %p1566_p6 }
 0x185   : > { %p1279_p0 = pneg %p1278_p13 }
 0x187   : > { %1473 = dma.done.wait (%p1279_p0), %s914_s12, 256  }
 0x188   : > { %1475 = vsyncadd (%p1279_p0), %s914_s12, 4294967040  ;;  %p19_p5 = scmp.ge.s32.totalorder %s1587_s14, 4   ;;  %s1748_s18 = smov %s1482_s19 }
 0x189   : > { %s1749_s19 = smov %s1486_s20  ;;  %s1750_s20 = smov %s1603_s23 }
 0x18a   : > { %s1751_s21 = smov %s1587_s14  ;;  %21 = sbr.rel (!%p19_p5) target bundleno = 6 (0x6), region = 97 }
 0x18f   :  { %920 = vsyncpa [#allocation3], 1 }
 0x190   :  { %922 = vsyncpa [#allocation3 + $0x1], 1 }
 0x191   :  { %923 = vsyncpa [#allocation6], 1 }
 0x192   :  { %924 = vsyncpa [#allocation4], 1 }
 0x193   :  { %926 = vsyncpa [#allocation4 + $0x1], 1 }

</bundles_post_ra>
